<compile_context>
chip_gen: v7x
topology: tpu7x:2x2x1
jax: 0.10.0
libtpu: 0.0.40
codegen_flags: <defaults>
</compile_context>

<pallas_src>
import functools

import jax
import jax.numpy as jnp
from jax import lax
from jax.experimental import pallas as pl
from jax.experimental.pallas import tpu as pltpu


def _round_up(v, m):
    return (v + m - 1) // m * m


def _pad_cast(a, target_shape, dtype):
    """Cast then zero-pad up to target_shape (one fused XLA convert+pad)."""
    a = a.astype(dtype)
    pads = [(0, t - s) for s, t in zip(a.shape, target_shape)]
    if any(p != (0, 0) for p in pads):
        a = jnp.pad(a, pads)
    return a


def _resident_spec(block_shape, index_map, nbytes):
    """BlockSpec for a block whose index_map is constant across the grid.

    Pallas double-buffers every input by default; for large resident blocks
    (the weight matrix) that doubles VMEM for no benefit, so request a single
    buffer via pipeline_mode=pl.Buffered(1).  Small blocks stay on the default
    (most-tested) pipeline; older jax without pipeline_mode falls back too.
    """
    if nbytes >= (1 << 20):
        try:
            return pl.BlockSpec(block_shape, index_map,
                                pipeline_mode=pl.Buffered(1))
        except (TypeError, ValueError, AttributeError):
            pass
    return pl.BlockSpec(block_shape, index_map)


def _pick_tile_m(n_pad, requested):
    """Largest multiple of 8 that divides n_pad and is <= requested."""
    cap = max(8, min(requested, n_pad))
    best = 8
    for cand in range(8, cap + 1, 8):
        if n_pad % cand == 0:
            best = cand
    return best


def _apply_epilogue(y, b_ref, *, normalize_embedding, relu):
    """Fused bias + L2-normalize + activation on an f32 row tile."""
    if b_ref is not None:
        y = y + b_ref[...]                       # (1, D_out_pad) broadcasts
    if normalize_embedding:
        # F.normalize(y, p=2, dim=2) == y / max(||y||_2, 1e-12).  Zero-padded
        # feature columns contribute 0 to the norm, so padding is safe.
        ssq = jnp.sum(y * y, axis=-1, keepdims=True)
        y = y * lax.rsqrt(jnp.maximum(ssq, 1e-24))   # rsqrt -> EUP slot
    if relu == "relu":
        y = jnp.maximum(y, 0.0)
    elif relu == "lrelu":
        y = jnp.where(y > 0, y, 0.1 * y)
    return y


# --------------------------------------------------------------------------
# Kernels
# --------------------------------------------------------------------------

def _gcn_small_kernel(x_ref, adj_ref, w_ref, *rest, add_self,
                      normalize_embedding, relu, has_bias, compute_dtype):
    """Whole-graph kernel for small N: both matmuls in one grid step."""
    if has_bias:
        b_ref, o_ref = rest
    else:
        b_ref = None
        (o_ref,) = rest

    x = x_ref[0].astype(compute_dtype)           # (N, D_in)
    adj = adj_ref[0].astype(compute_dtype)       # (N, N)
    agg = jnp.dot(adj, x, preferred_element_type=jnp.float32)
    if add_self:
        agg = agg + x.astype(jnp.float32)
    y = jnp.dot(agg.astype(compute_dtype), w_ref[...].astype(compute_dtype),
                preferred_element_type=jnp.float32)
    y = _apply_epilogue(y, b_ref, normalize_embedding=normalize_embedding,
                        relu=relu)
    o_ref[0] = y.astype(o_ref.dtype)


def _project_kernel(x_ref, w_ref, h_ref, *, compute_dtype):
    """h = x @ W for one row tile (used by the project-first path)."""
    x = x_ref[0].astype(compute_dtype)           # (tile_m, D_in_pad)
    h_ref[0] = jnp.dot(x, w_ref[...],
                       preferred_element_type=jnp.float32).astype(h_ref.dtype)


def _aggregate_kernel(*refs, add_self, project_in_epilogue, has_bias,
                      normalize_embedding, relu, compute_dtype):
    """acc += adj_tile @ feat_tile over k, with fused epilogue at the last k.

    feat is x (aggregate-first; projection by W happens in the epilogue) or
    h = x @ W (project-first; epilogue only adds bias / normalize / relu).
    """
    it = iter(refs)
    adj_ref = next(it)
    feat_ref = next(it)
    self_ref = next(it) if add_self else None
    w_ref = next(it) if project_in_epilogue else None
    b_ref = next(it) if has_bias else None
    o_ref = next(it)
    acc_ref = next(it)

    k = pl.program_id(2)
    nk = pl.num_programs(2)

    adj = adj_ref[0].astype(compute_dtype)       # (tile_m, tile_k)
    feat = feat_ref[0].astype(compute_dtype)     # (tile_k, F_pad)
    part = jnp.dot(adj, feat, preferred_element_type=jnp.float32)

    @pl.when(k == 0)
    def _():
        acc_ref[...] = part                      # no zero-fill + RMW pass

    @pl.when(k > 0)
    def _():
        acc_ref[...] += part

    @pl.when(k == nk - 1)
    def _():
        acc = acc_ref[...]
        if add_self:
            acc = acc + self_ref[0].astype(jnp.float32)
        if project_in_epilogue:
            y = jnp.dot(acc.astype(compute_dtype), w_ref[...],
                        preferred_element_type=jnp.float32)
        else:
            y = acc
        y = _apply_epilogue(y, b_ref, normalize_embedding=normalize_embedding,
                            relu=relu)
        o_ref[0] = y.astype(o_ref.dtype)


# --------------------------------------------------------------------------
# Wrapper
# --------------------------------------------------------------------------

def gcn_block_forward(x, adj, mask, weight, bias, *,
                      add_self=0, normalize_embedding=0, relu=0,
                      tile_m=256, tile_k=256,
                      compute_dtype=jnp.bfloat16, out_dtype=None,
                      small_n_threshold=128):
    """Pallas implementation of GCNBlock.forward (bn=0, dropout=0 path).

    x:      (B, N, D_in)
    adj:    (B, N, N)
    mask:   (B, N)     -- only used by the bn branch (not implemented)
    weight: (D_in, D_out)
    bias:   (D_out,) or None

    Pass compute_dtype=jnp.float32 for full f32 parity with PyTorch;
    the bf16 default uses the MXU native rate with f32 accumulation.
    """
    del mask
    B, N, D_in = x.shape
    D_out = weight.shape[1]
    has_bias = bias is not None
    out_dtype = x.dtype if out_dtype is None else out_dtype
    add_self = bool(add_self)
    normalize_embedding = bool(normalize_embedding)
    itemsize = jnp.dtype(compute_dtype).itemsize

    bias2d = bias.reshape(1, D_out).astype(jnp.float32) if has_bias else None

    # ---------------- small-graph fast path: no padding, one step/batch -----
    if N <= small_n_threshold:
        kernel = functools.partial(
            _gcn_small_kernel, add_self=add_self,
            normalize_embedding=normalize_embedding, relu=relu,
            has_bias=has_bias, compute_dtype=compute_dtype)
        operands = [x, adj, weight]
        in_specs = [
            pl.BlockSpec((1, N, D_in), lambda b: (b, 0, 0)),
            pl.BlockSpec((1, N, N), lambda b: (b, 0, 0)),
            _resident_spec((D_in, D_out), lambda b: (0, 0),
                           D_in * D_out * weight.dtype.itemsize),
        ]
        if has_bias:
            operands.append(bias2d)
            in_specs.append(_resident_spec((1, D_out), lambda b: (0, 0),
                                           D_out * 4))
        return pl.pallas_call(
            kernel,
            out_shape=jax.ShapeDtypeStruct((B, N, D_out), out_dtype),
            grid_spec=pltpu.PrefetchScalarGridSpec(
                num_scalar_prefetch=0,
                grid=(B,),
                in_specs=in_specs,
                out_specs=pl.BlockSpec((1, N, D_out), lambda b: (b, 0, 0)),
            ),
            compiler_params=pltpu.CompilerParams(
                dimension_semantics=("parallel",)),
        )(*operands)

    # ---------------- tiled path --------------------------------------------
    D_in_pad = _round_up(D_in, 128)
    D_out_pad = _round_up(D_out, 128)

    # Reduction tile: multiple of 128 (lane dim of adj).
    tile_k = min(max(_round_up(tile_k, 128), 128), _round_up(N, 128))
    N_pad = _round_up(N, tile_k)
    # Output row tile: multiple of 8 dividing N_pad, capped so both v7x
    # TensorCores get at least one parallel block (B * row_tiles >= 2).
    tile_m = _pick_tile_m(N_pad, tile_m)
    if B * (N_pad // tile_m) < 2:
        tile_m = _pick_tile_m(N_pad, N_pad // 2)
    rows = N_pad // tile_m
    ks = N_pad // tile_k

    w_p = _pad_cast(weight, (D_in_pad, D_out_pad), compute_dtype)
    b_p = _pad_cast(bias2d, (1, D_out_pad), jnp.float32) if has_bias else None

    # adj: stream as-is (cast per-tile in the kernel) when already aligned;
    # otherwise a single fused cast+pad to the compute dtype.
    if N == N_pad:
        adj_in = adj
    else:
        adj_in = _pad_cast(adj, (B, N_pad, N_pad), compute_dtype)

    project_first = D_out < D_in
    if project_first:
        # h = x @ W computed once, so the (dominant) aggregation streams the
        # narrower D_out features and uses a (tile_m, D_out_pad) accumulator.
        if N == N_pad and D_in == D_in_pad:
            x_in = x
        else:
            x_in = _pad_cast(x, (B, N_pad, D_in_pad), compute_dtype)
        feat = pl.pallas_call(
            functools.partial(_project_kernel, compute_dtype=compute_dtype),
            out_shape=jax.ShapeDtypeStruct((B, N_pad, D_out_pad),
                                           compute_dtype),
            grid_spec=pltpu.PrefetchScalarGridSpec(
                num_scalar_prefetch=0,
                grid=(B, rows),
                in_specs=[
                    pl.BlockSpec((1, tile_m, D_in_pad),
                                 lambda b, i: (b, i, 0)),
                    _resident_spec((D_in_pad, D_out_pad), lambda b, i: (0, 0),
                                   D_in_pad * D_out_pad * itemsize),
                ],
                out_specs=pl.BlockSpec((1, tile_m, D_out_pad),
                                       lambda b, i: (b, i, 0)),
            ),
            compiler_params=pltpu.CompilerParams(
                dimension_semantics=("parallel", "parallel")),
            cost_estimate=pl.CostEstimate(
                flops=int(2 * B * N_pad * D_in_pad * D_out_pad),
                transcendentals=0,
                bytes_accessed=int(x_in.size * x_in.dtype.itemsize
                                   + w_p.size * itemsize
                                   + B * N_pad * D_out_pad * itemsize)),
        )(x_in, w_p)
        f_pad = D_out_pad
    else:
        if N == N_pad and D_in == D_in_pad:
            feat = x
        else:
            feat = _pad_cast(x, (B, N_pad, D_in_pad), compute_dtype)
        f_pad = D_in_pad

    operands = [adj_in, feat]
    in_specs = [
        pl.BlockSpec((1, tile_m, tile_k), lambda b, i, k: (b, i, k)),   # adj
        pl.BlockSpec((1, tile_k, f_pad), lambda b, i, k: (b, k, 0)),    # feat
    ]
    if add_self:
        operands.append(feat)       # same array, row-tile view (index by i)
        in_specs.append(pl.BlockSpec((1, tile_m, f_pad),
                                     lambda b, i, k: (b, i, 0)))
    if not project_first:
        operands.append(w_p)
        in_specs.append(_resident_spec((D_in_pad, D_out_pad),
                                       lambda b, i, k: (0, 0),
                                       D_in_pad * D_out_pad * itemsize))
    if has_bias:
        operands.append(b_p)
        in_specs.append(_resident_spec((1, D_out_pad),
                                       lambda b, i, k: (0, 0),
                                       D_out_pad * 4))

    kernel = functools.partial(
        _aggregate_kernel,
        add_self=add_self,
        project_in_epilogue=not project_first,
        has_bias=has_bias,
        normalize_embedding=normalize_embedding,
        relu=relu,
        compute_dtype=compute_dtype,
    )

    flops = 2 * B * N_pad * N_pad * f_pad
    if not project_first:
        flops += 2 * B * N_pad * D_in_pad * D_out_pad
    bytes_accessed = (
        adj_in.size * adj_in.dtype.itemsize
        + rows * feat.size * feat.dtype.itemsize      # feat re-streamed / row tile
        + (feat.size * feat.dtype.itemsize if add_self else 0)
        + (0 if project_first else w_p.size * itemsize)
        + (D_out_pad * 4 if has_bias else 0)
        + B * N_pad * D_out_pad * jnp.dtype(out_dtype).itemsize)
    cost = pl.CostEstimate(
        flops=int(flops),
        transcendentals=int(B * N_pad if normalize_embedding else 0),
        bytes_accessed=int(bytes_accessed))

    out_p = pl.pallas_call(
        kernel,
        out_shape=jax.ShapeDtypeStruct((B, N_pad, D_out_pad), out_dtype),
        grid_spec=pltpu.PrefetchScalarGridSpec(
            num_scalar_prefetch=0,
            grid=(B, rows, ks),
            in_specs=in_specs,
            out_specs=pl.BlockSpec((1, tile_m, D_out_pad),
                                   lambda b, i, k: (b, i, 0)),
            scratch_shapes=[pltpu.VMEM((tile_m, f_pad), jnp.float32)],
        ),
        compiler_params=pltpu.CompilerParams(
            dimension_semantics=("parallel", "parallel", "arbitrary"),
            vmem_limit_bytes=64 * 1024 * 1024),
        cost_estimate=cost,
    )(*operands)

    return out_p[:, :N, :D_out]


# --------------------------------------------------------------------------
# Reference + self-test
# --------------------------------------------------------------------------

def _reference(x, adj, weight, bias, add_self, normalize_embedding, relu):
    y = jnp.matmul(adj, x)
    if add_self:
        y = y + x
    y = jnp.matmul(y, weight)
    if bias is not None:
        y = y + bias
    if normalize_embedding:
        norm = jnp.sqrt(jnp.sum(y * y, axis=2, keepdims=True))
        y = y / jnp.maximum(norm, 1e-12)
    if relu == "relu":
        y = jnp.maximum(y, 0.0)
    elif relu == "lrelu":
        y = jnp.where(y > 0, y, 0.1 * y)
    return y


if __name__ == "__main__":
    key = jax.random.PRNGKey(0)

    def make_inputs(k, B, N, D_in, D_out, with_bias=True):
        kx, ka, kw, kb = jax.random.split(k, 4)
        x = jax.random.normal(kx, (B, N, D_in), dtype=jnp.float32)
        a = jax.random.uniform(ka, (B, N, N), dtype=jnp.float32)
        adj = (a + jnp.swapaxes(a, 1, 2)) * 0.5
        mask = jnp.ones((B, N), dtype=jnp.float32)
        std = (2.0 / (D_in + D_out)) ** 0.5            # xavier_normal_
        w = jax.random.normal(kw, (D_in, D_out), dtype=jnp.float32) * std
        b = (jax.random.normal(kb, (D_out,), dtype=jnp.float32) * 0.1
             if with_bias else None)
        return x, adj, mask, w, b

    def check(out, ref, tol=2e-2):
        assert out.shape == ref.shape, (out.shape, ref.shape)
        err = float(jnp.max(jnp.abs(out.astype(jnp.float32) - ref)))
        bound = tol * (1.0 + float(jnp.max(jnp.abs(ref))))
        assert err <= bound, (err, bound)

    k1, k2, k3 = jax.random.split(key, 3)

    # 1) small-graph path, PyTorch default config.
    x, adj, mask, w, b = make_inputs(k1, 2, 16, 32, 64)
    out = jax.block_until_ready(gcn_block_forward(x, adj, mask, w, b))
    check(out, _reference(x, adj, w, b, 0, 0, 0))

    # 2) tiled aggregate-then-project path (D_out >= D_in), unaligned N,
    #    add_self + leaky relu, multi-tile grid.
    x, adj, mask, w, b = make_inputs(k2, 2, 200, 32, 64)
    out = jax.block_until_ready(
        gcn_block_forward(x, adj, mask, w, b, add_self=1, relu="lrelu",
                          tile_m=128, tile_k=128))
    check(out, _reference(x, adj, w, b, 1, 0, "lrelu"))

    # 3) tiled project-then-aggregate path (D_out < D_in), B=1 (exercises the
    #    >=2-parallel-blocks tile_m cap), normalize_embedding, no bias.
    x, adj, mask, w, b = make_inputs(k3, 1, 256, 128, 64, with_bias=False)
    out = jax.block_until_ready(
        gcn_block_forward(x, adj, mask, w, b, normalize_embedding=1,
                          tile_m=256, tile_k=128))
    check(out, _reference(x, adj, w, b, 0, 1, 0))

    print("KERNEL_OK")
</pallas_src>

<mosaic_0001>
module attributes {stable_mosaic.version = 11 : i64} {
  func.func @_gcn_small_kernel(%arg0: i32, %arg1: memref<1x16x32xf32, #tpu.memory_space<vmem>>, %arg2: memref<1x16x16xf32, #tpu.memory_space<vmem>>, %arg3: memref<32x64xf32, #tpu.memory_space<vmem>>, %arg4: memref<1x64xf32, #tpu.memory_space<vmem>>, %arg5: memref<1x16x64xf32, #tpu.memory_space<vmem>>) attributes {dimension_semantics = [#tpu.dimension_semantics<parallel>], iteration_bounds = array<i64: 2>, scalar_prefetch = 0 : i64, scratch_operands = 0 : i64, tpu.core_type = #tpu.core_type<tc>, window_params = [{transform_indices = @transform_0, window_bounds = array<i64: 1, 16, 32>}, {transform_indices = @transform_1, window_bounds = array<i64: 1, 16, 16>}, {pipeline_mode = #tpu.pipeline_mode<synchronous>, transform_indices = @transform_2, window_bounds = array<i64: 32, 64>}, {pipeline_mode = #tpu.pipeline_mode<synchronous>, transform_indices = @transform_3, window_bounds = array<i64: 1, 64>}, {transform_indices = @transform_4, window_bounds = array<i64: 1, 16, 64>}]} {
    %c0 = arith.constant 0 : index
    %c0_0 = arith.constant 0 : index
    %c0_1 = arith.constant 0 : index
    %0 = vector.load %arg1[%c0, %c0_0, %c0_1] : memref<1x16x32xf32, #tpu.memory_space<vmem>>, vector<1x16x32xf32>
    %1 = vector.shape_cast %0 : vector<1x16x32xf32> to vector<16x32xf32>
    %2 = arith.truncf %1 : vector<16x32xf32> to vector<16x32xbf16>
    %c0_2 = arith.constant 0 : index
    %c0_3 = arith.constant 0 : index
    %c0_4 = arith.constant 0 : index
    %3 = vector.load %arg2[%c0_2, %c0_3, %c0_4] : memref<1x16x16xf32, #tpu.memory_space<vmem>>, vector<1x16x16xf32>
    %4 = vector.shape_cast %3 : vector<1x16x16xf32> to vector<16x16xf32>
    %5 = arith.truncf %4 : vector<16x16xf32> to vector<16x16xbf16>
    %cst = arith.constant dense<0.000000e+00> : vector<16x32xf32>
    %6 = tpu.matmul %5, %2, %cst {dimension_numbers = #tpu.dot_dimension_numbers<[1], [0], [0], [1], [0, 0, 1, 1], [], []>} : vector<16x16xbf16>, vector<16x32xbf16>, vector<16x32xf32> -> vector<16x32xf32>
    %7 = arith.truncf %6 : vector<16x32xf32> to vector<16x32xbf16>
    %c0_5 = arith.constant 0 : index
    %c0_6 = arith.constant 0 : index
    %8 = vector.load %arg3[%c0_5, %c0_6] : memref<32x64xf32, #tpu.memory_space<vmem>>, vector<32x64xf32>
    %9 = arith.truncf %8 : vector<32x64xf32> to vector<32x64xbf16>
    %cst_7 = arith.constant dense<0.000000e+00> : vector<16x64xf32>
    %10 = tpu.matmul %7, %9, %cst_7 {dimension_numbers = #tpu.dot_dimension_numbers<[1], [0], [0], [1], [0, 0, 1, 1], [], []>} : vector<16x32xbf16>, vector<32x64xbf16>, vector<16x64xf32> -> vector<16x64xf32>
    %c0_8 = arith.constant 0 : index
    %c0_9 = arith.constant 0 : index
    %11 = vector.load %arg4[%c0_8, %c0_9] : memref<1x64xf32, #tpu.memory_space<vmem>>, vector<1x64xf32>
    %12 = vector.broadcast %11 : vector<1x64xf32> to vector<16x64xf32>
    %13 = arith.addf %10, %12 : vector<16x64xf32>
    %c0_10 = arith.constant 0 : index
    %c0_11 = arith.constant 0 : index
    %c0_12 = arith.constant 0 : index
    %14 = vector.load %arg5[%c0_10, %c0_11, %c0_12] : memref<1x16x64xf32, #tpu.memory_space<vmem>>, vector<1x16x64xf32>
    %15 = vector.shape_cast %14 : vector<1x16x64xf32> to vector<16x64xf32>
    %16 = vector.shape_cast %13 : vector<16x64xf32> to vector<1x16x64xf32>
    tpu.vector_store %arg5[%c0_10, %c0_11, %c0_12], %16 {strides = array<i32>} : memref<1x16x64xf32, #tpu.memory_space<vmem>>, vector<1x16x64xf32>,
    return
  }
  func.func @transform_0(%arg0: i32) -> (i32, i32, i32) {
    %c0_i32 = arith.constant 0 : i32
    %c0_i32_0 = arith.constant 0 : i32
    %c0_i32_1 = arith.constant 0 : i32
    return %arg0, %c0_i32, %c0_i32_0 : i32, i32, i32
  }
  func.func @transform_1(%arg0: i32) -> (i32, i32, i32) {
    %c0_i32 = arith.constant 0 : i32
    %c0_i32_0 = arith.constant 0 : i32
    %c0_i32_1 = arith.constant 0 : i32
    return %arg0, %c0_i32, %c0_i32_0 : i32, i32, i32
  }
  func.func @transform_2(%arg0: i32) -> (i32, i32) {
    %c0_i32 = arith.constant 0 : i32
    %c0_i32_0 = arith.constant 0 : i32
    %c0_i32_1 = arith.constant 0 : i32
    return %c0_i32, %c0_i32_0 : i32, i32
  }
  func.func @transform_3(%arg0: i32) -> (i32, i32) {
    %c0_i32 = arith.constant 0 : i32
    %c0_i32_0 = arith.constant 0 : i32
    %c0_i32_1 = arith.constant 0 : i32
    return %c0_i32, %c0_i32_0 : i32, i32
  }
  func.func @transform_4(%arg0: i32) -> (i32, i32, i32) {
    %c0_i32 = arith.constant 0 : i32
    %c0_i32_0 = arith.constant 0 : i32
    %c0_i32_1 = arith.constant 0 : i32
    return %arg0, %c0_i32, %c0_i32_0 : i32, i32, i32
  }
}

</mosaic_0001>

<bundles_post_ra>
// kernel: tpu_custom_call.1
= control target key start
LH: loop header
LB: loop body
LE: loop exit
PB: predicated region body
PF: predicated region fallthrough
CT: control target
= control target key end

     0   :  { %s1076_s0 = inlined_call_operand.hbm [shape: f32[2,16,32], index: 0, kind: input, shape index: {}]   ;;  %s1077_s1 = inlined_call_operand.hbm [shape: f32[2,16,16], index: 1, kind: input, shape index: {}]   ;;  %s1078_s2 = inlined_call_operand.hbm [shape: f32[32,64], index: 2, kind: input, shape index: {}]   ;;  %s1079_s3 = inlined_call_operand.vmem [shape: f32[1,64], index: 3, kind: input, shape index: {}]   ;;  %s1080_s4 = inlined_call_operand.hbm [shape: f32[2,16,64], index: 4, kind: output, shape index: {}]  }
   0x1   :  { %1088 = sst [smem:[#allocation14_spill]] %s1076_s0 }
   0x2   :  { %1089 = sst [smem:[#allocation15_spill]] %s1078_s2 }
   0x3   :  { %9 = vsyncpa [#allocation3], 0 }
   0x4   :  { %11 = vsyncpa [#allocation3 + $0x1], 0 }
   0x5   :  { %12 = vsyncpa [#allocation6], 0 }
   0x6   :  { %14 = vsyncpa [#allocation6 + $0x1], 0 }
   0x7   :  { %15 = vsyncpa [#allocation4], 0 }
   0x8   :  { %17 = vsyncpa [#allocation4 + $0x1], 0  ;;  %s815_s15 = smov 0   ;;  %s817_s16 = smov 0  }
   0x9   :  { %s819_s17 = smov 0   ;;  %s821_s18 = smov 0  }
   0xa LB: > { %s836_s19 = sadd.s32 4294967295, %s778_s18   ;;  %s503_s20 = sadd.s32 4294967294, %s778_s18   ;;  %s778_s18 = sphi %s821_s18, %s1112_s18   ;;  %s774_s17 = sphi %s819_s17, %s1111_s17   ;;  %s770_s16 = sphi %s817_s16, %s1110_s16   ;;  %s766_s15 = sphi %s815_s15, %s1109_s15  }
   0xb   : > { %p43_p0 = scmp.ne.s32.totalorder %s770_s16, %s766_s15  ;;  %p1081_p1 = scmp.eq.s32.totalorder %s836_s19, 0 }
   0xc   : > { %p141_p3 = scmp.eq.s32.totalorder %s503_s20, 1  ;;  %p504_p5 = scmp.ge.s32.totalorder %s778_s18, 1 }
   0xd   : > { %p845_p4 = por %p1081_p1, %p43_p0  ;;  %p148_p7 = scmp.lt.s32.totalorder %s778_s18, 3 }
   0xe   : > { %p850_p6 = por %p141_p3, %p43_p0  ;;  %s780_s24 = smov [#allocation7]  }
   0xf   : > { %s1090_s21 = scalar_select %p845_p4, 1, 0 }
  0x10   : > { %s1091_s22 = scalar_select %p850_p6, 1, 0 }
  0x11   : > { %p855_p8 = pnand %p504_p5, %p148_p7  ;;  %s160_s25 = sshll.u32 %s780_s24, 4  ;;  %s859_s25 = int_to_ptr.vmem [resolvable:$true] %s160_s25 }
  0x12   : > { %s871_s27 = sadd.s32 1, %s778_s18   ;;  %s30_s28 = sadd.s32 1, %s774_s17 }
  0x13   : > { %s1092_s23 = scalar_select %p855_p8, 1, 0 }
  0x14   : > { %p558_p9 = pneg %p855_p8  ;;  %s27_s29 = ssub.s32 %s778_s18, %s871_s27 }
  0x15   : > { %s1094_s2 = sld [smem:[#allocation15_spill]] }
  0x16   : > { %p866_p11 = pnand %p558_p9, %p1081_p1 }
  0x18   : > { %p618_p13 = pneg %p866_p11 }
  0x1b   : > { %s616_s6 = scalar_lea.hbm %s1094_s2, 512 }
  0x1c   : > { %p617_p12 = scmp.ne.s32.totalorder %s1094_s2, %s616_s6  ;;  %p623_p5 = scmp.lt.u32.totalorder %s616_s6, %s1094_s2 }
  0x1e   : > { %p619_p0 = pnand %p618_p13, %p617_p12 }
  0x20   : > { %p620_p3 = pneg %p619_p0 }
  0x22   : > { %p625_p7 = pnand %p623_p5, %p620_p3 }
  0x24   : > { %628 = shalt.err (!%p625_p7)
}
  0x25   : > { %s629_s11 = scalar_lea.vmem %s859_s25, 512  ;;  %p637_p2 = scmp.lt.s32.totalorder %s859_s25, %s859_s25 }
  0x26   : > { %p630_p9 = scmp.ne.s32.totalorder %s859_s25, %s629_s11  ;;  %p638_p6 = scmp.lt.s32.totalorder %s629_s11, %s629_s11 }
  0x28   : > { %p632_p10 = pnand %p630_p9, %p618_p13  ;;  %p639_p4 = por %p638_p6, %p637_p2 }
  0x2a   : > { %p633_p1 = pneg %p632_p10 }
  0x2c   : > { %p640_p8 = pnand %p639_p4, %p633_p1 }
  0x2e   : > { %643 = shalt.err (!%p640_p8)
}
  0x2f   : > { %s1084_s12 = smov 128   ;;  %s1086_s13 = smov 8  }
  0x30   : > { %561 = dma.hbm_to_vmem [thread:$0]  (!%p866_p11), %s1094_s2, 512, %s859_s25, [#allocation6], %s1084_s12, %s1084_s12, %s1086_s13  }
  0x31   : > { %p28_p1 = scmp.eq.s32.totalorder %s27_s29, 0  ;;  %p37_p2 = scmp.ne.s32.totalorder %s774_s17, %s770_s16 }
  0x32   : > { %p38_p4 = scmp.eq.s32.totalorder %s778_s18, 0  ;;  %p574_p6 = scmp.lt.s32.totalorder %s778_s18, 2 }
  0x33   : > { %s905_s24 = scalar_select %p28_p1, %s774_s17, %s30_s28  }
  0x34   : > { %p39_p8 = por %p38_p4, %p37_p2  ;;  %p1096_p10 = scmp.eq.s32.totalorder %s836_s19, 1 }
  0x35   : > { %1095 = sst [smem:[#allocation13_spill]] %s905_s24  ;;  %s177_s26 = sand.u32 1, %s774_s17  }
  0x36   : > { %p909_p12 = por %p1096_p10, %p37_p2  ;;  %s526_s5 = sshll.u32 %s778_s18, 8 }
  0x37   : > { %s915_s6 = sshll.u32 %s177_s26, 4  ;;  %s1098_s0 = sld [smem:[#allocation14_spill]] }
  0x38   : > { %s181_s28 = scalar_lea.vmem [#allocation2], %s915_s6  ;;  %p923_p11 = pnand %p574_p6, %p39_p8 }
  0x39   : > { %s188_s29 = sshll.u32 %s181_s28, 4  ;;  %s932_s14 = scalar_lea.hbm %s1077_s1, %s526_s5  ;;  %s927_s29 = int_to_ptr.vmem [resolvable:$true] %s188_s29 }
  0x3a   : > { %s934_s20 = scalar_lea.sflag [#allocation3], %s177_s26  ;;  %p646_p0 = pneg %p923_p11 }
  0x3d   : > { %s920_s25 = scalar_lea.hbm %s1098_s0, %s526_s5  ;;  %s649_s12 = scalar_lea.hbm %s1098_s0, 512 }
  0x3e   : > { %s644_s7 = scalar_lea.hbm %s920_s25, 256  ;;  %p650_p7 = scmp.lt.u32.totalorder %s920_s25, %s1098_s0 }
  0x3f   : > { %p645_p13 = scmp.ne.s32.totalorder %s920_s25, %s644_s7  ;;  %p651_p9 = scmp.lt.u32.totalorder %s649_s12, %s644_s7 }
  0x40   : > { %p653_p2 = scmp.lt.u32.totalorder %s644_s7, %s920_s25 }
  0x41   : > { %p647_p3 = pnand %p646_p0, %p645_p13  ;;  %p652_p1 = por %p651_p9, %p650_p7 }
  0x43   : > { %p648_p5 = pneg %p647_p3  ;;  %p654_p4 = por %p653_p2, %p652_p1 }
  0x45   : > { %p655_p6 = pnand %p654_p4, %p648_p5 }
  0x47   : > { %658 = shalt.err (!%p655_p6)
}
  0x48   : > { %s659_s26 = scalar_lea.vmem %s927_s29, 256  ;;  %s783_s5 = smov [#allocation2]  }
  0x49   : > { %p660_p8 = scmp.ne.s32.totalorder %s927_s29, %s659_s26  ;;  %s664_s10 = sshll.u32 %s783_s5, 4  ;;  %s665_s10 = int_to_ptr.vmem [resolvable:$false] %s664_s10 }
  0x4a   : > { %s666_s2 = scalar_lea.vmem %s665_s10, 512  ;;  %p667_p3 = scmp.lt.s32.totalorder %s927_s29, %s665_s10 }
  0x4b   : > { %p662_p10 = pnand %p660_p8, %p646_p0  ;;  %p668_p7 = scmp.lt.s32.totalorder %s666_s2, %s659_s26 }
  0x4d   : > { %p663_p13 = pneg %p662_p10  ;;  %p669_p9 = por %p668_p7, %p667_p3 }
  0x4f   : > { %p670_p1 = pnand %p669_p9, %p663_p13 }
  0x51   : > { %673 = shalt.err (!%p670_p1)
}
  0x52   : > { %s1100_s12 = smov 8   ;;  %s1101_s13 = smov 128  }
  0x53   : > { %565 = dma.hbm_to_vmem [thread:$0]  (!%p923_p11), %s920_s25, 256, %s927_s29, %s934_s20, %s1101_s13, %s1101_s13, %s1100_s12  }
  0x54   : > { %s202_s11 = scalar_lea.vmem [#allocation5], %s915_s6  ;;  %s198_s8 = sand.u32 1, %s778_s18  }
  0x55   : > { %s209_s7 = sshll.u32 %s202_s11, 4  ;;  %s969_s28 = scalar_lea.sflag [#allocation6], %s198_s8  ;;  %s967_s7 = int_to_ptr.vmem [resolvable:$true] %s209_s7 }
  0x56   : > { %s674_s26 = scalar_lea.hbm %s932_s14, 256  ;;  %s679_s2 = scalar_lea.hbm %s1077_s1, 512 }
  0x57   : > { %p675_p5 = scmp.ne.s32.totalorder %s932_s14, %s674_s26  ;;  %p680_p6 = scmp.lt.u32.totalorder %s932_s14, %s1077_s1 }
  0x58   : > { %p681_p8 = scmp.lt.u32.totalorder %s679_s2, %s674_s26  ;;  %p683_p13 = scmp.lt.u32.totalorder %s674_s26, %s932_s14 }
  0x59   : > { %p677_p2 = pnand %p675_p5, %p646_p0 }
  0x5a   : > { %p682_p10 = por %p681_p8, %p680_p6 }
  0x5b   : > { %p678_p4 = pneg %p677_p2 }
  0x5c   : > { %p684_p3 = por %p683_p13, %p682_p10 }
  0x5e   : > { %p685_p7 = pnand %p684_p3, %p678_p4 }
  0x60   : > { %688 = shalt.err (!%p685_p7)
}
  0x61   : > { %s689_s6 = scalar_lea.vmem %s967_s7, 256  ;;  %s784_s25 = smov [#allocation5]  }
  0x62   : > { %p690_p9 = scmp.ne.s32.totalorder %s967_s7, %s689_s6  ;;  %s694_s29 = sshll.u32 %s784_s25, 4  ;;  %s695_s29 = int_to_ptr.vmem [resolvable:$false] %s694_s29 }
  0x63   : > { %s696_s0 = scalar_lea.vmem %s695_s29, 512  ;;  %p697_p2 = scmp.lt.s32.totalorder %s967_s7, %s695_s29 }
  0x64   : > { %p692_p1 = pnand %p690_p9, %p646_p0  ;;  %p698_p6 = scmp.lt.s32.totalorder %s696_s0, %s689_s6 }
  0x66   : > { %p693_p5 = pneg %p692_p1  ;;  %p699_p8 = por %p698_p6, %p697_p2 }
  0x68   : > { %p700_p10 = pnand %p699_p8, %p693_p5 }
  0x6a   : > { %703 = shalt.err (!%p700_p10)
}
  0x6b   : > { %568 = dma.hbm_to_vmem [thread:$0]  (!%p923_p11), %s932_s14, 256, %s967_s7, %s969_s28, %s1101_s13, %s1101_s13, %s1100_s12  }
  0x6c   : > { %p1102_p0 = scmp.ne.s32.totalorder %s1092_s23, 0 }
  0x6d   : > { %s1001_s24 = sand.u32 (!%p1102_p0), 1, %s770_s16   ;;  %p1103_p4 = scmp.ne.s32.totalorder (!%p1102_p0), %s1090_s21, 0 }
  0x6e   : > { %221 = sbr.rel (%p1102_p0) target bundleno = 577 (0x241), region = 36  ;;  %s1004_s20 = sshll.u32 (!%p1102_p0), %s1001_s24, 4 }
  0x6f   : > { %s224_s9 = scalar_lea.sflag (!%p1102_p0), [#allocation3], %s1001_s24  ;;  %s227_s11 = scalar_lea.vmem (!%p1102_p0), [#allocation2], %s1004_s20 }
  0x75   : > { %749 = dma.done.wait (%p1103_p4), %s224_s9, 256  }
  0x76   : > { %751 = vsyncadd (%p1103_p4), %s224_s9, 4294967040  ;;  %s232_s23 = sand.u32 1, %s836_s19   ;;  %s236_s12 = scalar_lea.vmem [#allocation5], %s1004_s20 }
  0x77   : > { %s233_s14 = scalar_lea.sflag [#allocation6], %s232_s23 }
  0x78   : > { %753 = dma.done.wait (%p1103_p4), %s233_s14, 256  }
  0x79   : > { %755 = vsyncadd (%p1103_p4), %s233_s14, 4294967040  ;;  %p1104_p11 = scmp.eq.s32.totalorder %s836_s19, 0 }
  0x7b   : > { %757 = dma.done.wait (%p1104_p11), [#allocation6], 512   ;;  %p1105_p13 = pmov %p1104_p11 }
  0x7c   : > { %v785_v0 = vmov 0.0   ;;  %vm786_vm0 = vmmov 0   ;;  %v271_v1 = vld [vmem:[%s227_s11] sm:$0xff]  ;;  %v272_v2 = vld [vmem:[%s227_s11 + $0x8] sm:$0xff]  ;;  %vm277_vm1 = vcmask 130048   ;;  %vm336_vm2 = vcmask 261120  }
  0x7d   : > { %759 = vsyncadd (%p1105_p13), [#allocation6], 4294966784  ;;  %534 = vmatprep.subr.bf16.mxu0 %v785_v0  ;;  %536 = vmatprep.mubr.msk.bf16.mxu0 %vm786_vm0, %v785_v0  ;;  %v274_v3 = vld [vmem:[%s236_s12] sm:$0xff]  ;;  %v273_v4 = vpack.c.bf16 %v272_v2, %v271_v1  ;;  %v275_v5 = vld [vmem:[%s236_s12 + $0x8] sm:$0xff]  ;;  %s269_s7 = scalar_lea.vmem [#allocation8], %s1004_s20  ;;  %s528_s28 = sshll.u32 %s836_s19, 8 }
  0x7e   : > { %540 = vmatprep.subr.bf16.mxu1 %v785_v0  ;;  %544 = vmatprep.mubr.msk.bf16.mxu1 %vm786_vm0, %v785_v0  ;;  %v323_v6 = vld [vmem:[#allocation7] sm:$0xff]  ;;  %v324_v7 = vld [vmem:[#allocation7 + $0x8] sm:$0xff]  ;;  %v276_v8 = vpack.c.bf16 %v275_v5, %v274_v3  ;;  %v325_v10 = vld [vmem:[#allocation7 + $0x10] sm:$0xff]  ;;  %s398_s8 = sshll.u32 %s269_s7, 4  ;;  %vm381_vm3 = vcmask 523264   ;;  %s1032_s10 = scalar_lea.hbm %s1080_s4, %s528_s28  ;;  %s1027_s8 = int_to_ptr.vmem [resolvable:$true] %s398_s8 }
  0x7f   : > { %v327_v9 = vpack.c.bf16 %v324_v7, %v323_v6  ;;  %535 = vmatpush3.bf16.msra.mxu0 %v273_v4  ;;  %v326_v11 = vld [vmem:[#allocation7 + $0x18] sm:$0xff]  ;;  %v519_v18 = vld [vmem:[%s1079_s3] ss:$0 sm:$0xff]  ;;  %s385_s19 = scalar_lea.sflag [#allocation4], %s1001_s24  ;;  %s704_s2 = scalar_lea.vmem %s1027_s8, 256 }
  0x80   : > { %v328_v12 = vpack.c.bf16 %v326_v11, %v325_v10  ;;  %p705_p3 = scmp.ne.s32.totalorder %s1027_s8, %s704_s2  ;;  %s787_s6 = smov [#allocation8]  }
  0x81   : > { %541 = vmatpush3.bf16.msra.mxu1 %v327_v9  ;;  %s708_s25 = sshll.u32 %s787_s6, 4  ;;  %s709_s25 = int_to_ptr.vmem [resolvable:$false] %s708_s25 }
  0x82   : > { %542 = vmatprep.subr.bf16.mxu1 %v785_v0  ;;  %537 = vmatmul.mubr.msk.bf16.vlgmr.msra.gmra.mrb[0].mxu0 %vm277_vm1, %v276_v8  ;;  %p706_p7 = pnand %p705_p3, %p909_p12  ;;  %s710_s29 = scalar_lea.vmem %s709_s25, 512 }
  0x83   : > { %p711_p1 = scmp.lt.s32.totalorder %s1027_s8, %s709_s25  ;;  %p712_p5 = scmp.lt.s32.totalorder %s710_s29, %s704_s2 }
  0x84   : > { %p707_p9 = pneg %p706_p7 }
  0x85   : > { %543 = vmatpush3.bf16.msra.mxu1 %v328_v12  ;;  %p713_p2 = por %p712_p5, %p711_p1 }
  0x87   : > { %p714_p6 = pnand %p713_p2, %p707_p9 }
 0x155   : > { %v315_v13 = vpop.f32.mrb[0].mxu0 }
 0x156   : > { %v538_v14 = vpop.f32.mrb[1].mxu0 }
 0x157   : > { %v318_v15 = vpop.f32.mrb[2].mxu0 }
 0x158   : > { %v322_v16 = vpack.c.bf16 %v318_v15, %v315_v13  ;;  %v539_v17 = vpop.f32.mrb[3].mxu0 }
 0x15a   : > { %545 = vmatmul.mubr.msk.bf16.vlgmr.msra.gmra.mrb[0].mxu1 %vm336_vm2, %v322_v16 }
 0x22d   : > { %v374_v19 = vpop.f32.mrb[0].mxu1 }
 0x22e   : > { %v375_v20 = vadd.f32 %v519_v18, %v374_v19  ;;  %v546_v21 = vpop.f32.mrb[1].mxu1 }
 0x22f   : > { %v377_v22 = vpop.f32.mrb[2].mxu1 }
 0x230   : > { %382 = vst.msk [vmem:[%s269_s7] sm:$0xff] %vm381_vm3, %v375_v20  ;;  %v378_v23 = vadd.f32 %v519_v18, %v377_v22  ;;  %v547_v24 = vpop.f32.mrb[3].mxu1 }
 0x232   : > { %383 = vst.msk [vmem:[%s269_s7 + $0x8] sm:$0xff] %vm381_vm3, %v378_v23 }
 0x233   : > { %717 = shalt.err (!%p714_p6)
}
 0x234   : > { %s718_s0 = scalar_lea.hbm %s1032_s10, 256  ;;  %s722_s11 = scalar_lea.hbm %s1080_s4, 512 }
 0x235   : > { %p719_p8 = scmp.ne.s32.totalorder %s1032_s10, %s718_s0  ;;  %p723_p4 = scmp.lt.u32.totalorder %s1032_s10, %s1080_s4 }
 0x236   : > { %p724_p11 = scmp.lt.u32.totalorder %s722_s11, %s718_s0  ;;  %p726_p3 = scmp.lt.u32.totalorder %s718_s0, %s1032_s10 }
 0x237   : > { %p720_p10 = pnand %p719_p8, %p909_p12 }
 0x238   : > { %p725_p13 = por %p724_p11, %p723_p4 }
 0x239   : > { %p721_p0 = pneg %p720_p10 }
 0x23a   : > { %p727_p7 = por %p726_p3, %p725_p13 }
 0x23c   : > { %p728_p9 = pnand %p727_p7, %p721_p0 }
 0x23e   : > { %731 = shalt.err (!%p728_p9)
}
 0x23f   : > { %s788_s12 = smov 128   ;;  %s789_s21 = smov 8  }
 0x240   : > { %556 = dma.vmem_to_hbm [thread:$0]  (%p909_p12), %s1027_s8, 256, %s1032_s10, %s385_s19, %s788_s12, %s788_s12, %s789_s21  }
 0x241 PF: > { %s413_s13 = sand.u32 1, %s766_s15   ;;  %p1106_p1 = scmp.ne.s32.totalorder %s1091_s22, 0 }
 0x242   : > { %p1107_p5 = scmp.ge.s32.totalorder %s778_s18, 2  ;;  %s414_s7 = scalar_lea.sflag [#allocation4], %s413_s13 }
 0x244   : > { %p570_p2 = pnand %p1107_p5, %p1106_p1 }
 0x246   : > { %761 = dma.done.wait (!%p570_p2), %s414_s7, 256  }
 0x247   : > { %763 = vsyncadd (!%p570_p2), %s414_s7, 4294967040  ;;  %s1108_s28 = sld [smem:[#allocation13_spill]]  ;;  %p20_p6 = scmp.ge.s32.totalorder %s871_s27, 4  }
 0x248   : > { %s1109_s15 = smov %s770_s16  ;;  %s1110_s16 = smov %s774_s17 }
 0x249   : > { %s1112_s18 = smov %s871_s27  ;;  %22 = sbr.rel (!%p20_p6) target bundleno = 10 (0xa), region = 98 }
 0x24d   : > { %s1111_s17 = smov %s1108_s28 }
 0x250   :  { %419 = vsyncpa [#allocation3], 1 }
 0x251   :  { %421 = vsyncpa [#allocation3 + $0x1], 1 }
 0x252   :  { %422 = vsyncpa [#allocation6], 1 }
 0x253   :  { %424 = vsyncpa [#allocation6 + $0x1], 1 }
 0x254   :  { %425 = vsyncpa [#allocation4], 1 }
 0x255   :  { %427 = vsyncpa [#allocation4 + $0x1], 1 }

</bundles_post_ra>
